<compile_context>
chip_gen: v7x
topology: tpu7x:2x2x1
jax: 0.10.0
libtpu: 0.0.40
codegen_flags: <defaults>
</compile_context>

<pallas_src>
import functools

import jax
import jax.numpy as jnp
from jax import lax
from jax.experimental import pallas as pl
from jax.experimental.pallas import tpu as pltpu


def _attn_kernel(q_ref, k_ref, o_ref, *, num_heads: int, head_dim: int,
                 inv_temperature: float):
    # q_ref: (tb, embed); k_ref: (d, tb, embed); o_ref: (d, tb, heads)
    q = q_ref[...]
    k = k_ref[...]
    d, tb, embed = k.shape

    # Elementwise q*k in the input dtype (bf16-native VALU on v6e/v7x, f32 else);
    # the f32 accumulation of the head_dim reduction happens on the MXU below.
    p = q[jnp.newaxis, :, :] * k                              # (d, tb, embed)

    # Segmented lane reduction over head_dim expressed as a matmul with a constant
    # selection matrix: sel[e, h] = 1 iff column e belongs to head h.
    # (Built without integer division; tiny, HBM-bound kernel so its cost is nil.)
    r = lax.broadcasted_iota(jnp.int32, (embed, num_heads), 0)
    c = lax.broadcasted_iota(jnp.int32, (embed, num_heads), 1) * head_dim
    sel = ((r >= c) & (r < c + head_dim)).astype(p.dtype)     # (embed, heads)

    scores = jnp.dot(p.reshape(d * tb, embed), sel,
                     preferred_element_type=jnp.float32)      # (d*tb, heads) f32
    scores = scores.reshape(d, tb, num_heads) * inv_temperature

    # Softmax over the leading d axis (torch F.softmax(dim=0)). Exact divide: the
    # kernel is HBM-bandwidth bound, so the VPU divide is free and rows sum to 1.
    m = jnp.max(scores, axis=0, keepdims=True)                # (1, tb, heads)
    e = jnp.exp(scores - m)                                   # (d, tb, heads)
    o_ref[...] = (e / jnp.sum(e, axis=0, keepdims=True)).astype(o_ref.dtype)


def _vmem_capacity_bytes() -> int:
    try:
        cap = getattr(pltpu.get_tpu_info(), "vmem_capacity_bytes", None)
        if cap:
            return int(cap)
    except Exception:
        pass
    return 64 * 1024 * 1024  # conservative default (v7x per-core VMEM)


def _pick_batch_block(b: int, per_row_bytes: int, budget_bytes: int) -> int:
    """Largest batch block (multiple of 8, or full b) whose double-buffered tiles fit
    the budget, capped so the grid keeps >= 2 steps when b allows (megacore split on
    v7x + cross-step DMA/compute overlap on all generations)."""
    fit = max(1, budget_bytes // max(per_row_bytes, 1))
    if fit >= b:
        if b >= 16:
            return max(8, (b // 2) // 8 * 8)   # keep at least 2 grid steps
        return b                               # tiny batch: single full block
    # TODO(synk): if even an 8-row block exceeds the budget (very large d), stream d
    # on a second "arbitrary" grid axis with an online softmax instead of clamping.
    return max(8, fit // 8 * 8)


def attn_forward(query: jax.Array, keys: jax.Array, num_heads: int,
                 temperature: float = 1.0) -> jax.Array:
    """query: (b, heads*head_dim); keys: (d, b, heads*head_dim) -> (d, b, heads)."""
    b, embed = query.shape
    d, b2, embed2 = keys.shape
    assert b == b2 and embed == embed2 and embed % num_heads == 0
    head_dim = embed // num_heads

    k_item = jnp.dtype(keys.dtype).itemsize
    q_item = jnp.dtype(query.dtype).itemsize
    o_item = jnp.dtype(query.dtype).itemsize

    # Generation-aware VMEM budget for the double-buffered tiles of one grid step.
    cap = _vmem_capacity_bytes()
    budget = min(int(cap * 0.5), 48 << 20)
    per_row = 2 * (d * embed * k_item + embed * q_item + d * num_heads * o_item)
    tb = _pick_batch_block(b, per_row, budget)
    grid = (pl.cdiv(b, tb),)
    vmem_limit = int(min(cap, max(32 << 20, per_row * tb + (8 << 20))))

    kernel = functools.partial(
        _attn_kernel, num_heads=num_heads, head_dim=head_dim,
        inv_temperature=1.0 / float(temperature))

    return pl.pallas_call(
        kernel,
        out_shape=jax.ShapeDtypeStruct((d, b, num_heads), query.dtype),
        grid_spec=pltpu.PrefetchScalarGridSpec(
            num_scalar_prefetch=0,
            grid=grid,
            in_specs=[
                pl.BlockSpec((tb, embed), lambda i: (i, 0)),
                pl.BlockSpec((d, tb, embed), lambda i: (0, i, 0)),
            ],
            out_specs=pl.BlockSpec((d, tb, num_heads), lambda i: (0, i, 0)),
        ),
        compiler_params=pltpu.CompilerParams(
            dimension_semantics=("parallel",),
            vmem_limit_bytes=vmem_limit,
        ),
    )(query, keys)


def _reference(query, keys, num_heads, temperature):
    b, embed = query.shape
    d = keys.shape[0]
    head_dim = embed // num_heads
    q = query.reshape(b, num_heads, head_dim)
    k = keys.reshape(d, b, num_heads, head_dim)
    attn = jnp.einsum('beh,dbeh->dbe', q, k) / temperature
    return jax.nn.softmax(attn, axis=0)


if __name__ == "__main__":
    num_heads = 4
    temperature = 2.0
    b, head_dim, d = 2, 8, 8
    embed = num_heads * head_dim  # 32

    key = jax.random.PRNGKey(0)
    kq, kk = jax.random.split(key)
    query = jax.random.normal(kq, (b, embed), dtype=jnp.float32)
    keys = jax.random.normal(kk, (d, b, embed), dtype=jnp.float32)

    out = jax.block_until_ready(attn_forward(query, keys, num_heads, temperature))

    ref = _reference(query, keys, num_heads, temperature)
    assert out.shape == (d, b, num_heads)
    assert jnp.allclose(out, ref, atol=1e-5, rtol=1e-5)
    # Softmax over d must sum to 1 (exact divide, no approx reciprocal).
    assert jnp.allclose(jnp.sum(out, axis=0), 1.0, atol=1e-5)

    print("KERNEL_OK")
</pallas_src>

<mosaic_0001>
module attributes {stable_mosaic.version = 11 : i64} {
  func.func @_attn_kernel(%arg0: i32, %arg1: memref<2x32xf32, #tpu.memory_space<vmem>>, %arg2: memref<8x2x32xf32, #tpu.memory_space<vmem>>, %arg3: memref<8x2x4xf32, #tpu.memory_space<vmem>>) attributes {dimension_semantics = [#tpu.dimension_semantics<parallel>], iteration_bounds = array<i64: 1>, scalar_prefetch = 0 : i64, scratch_operands = 0 : i64, tpu.core_type = #tpu.core_type<tc>, window_params = [{transform_indices = @transform_0, window_bounds = array<i64: 2, 32>}, {transform_indices = @transform_1, window_bounds = array<i64: 8, 2, 32>}, {transform_indices = @transform_2, window_bounds = array<i64: 8, 2, 4>}]} {
    %c0 = arith.constant 0 : index
    %c0_0 = arith.constant 0 : index
    %0 = vector.load %arg1[%c0, %c0_0] : memref<2x32xf32, #tpu.memory_space<vmem>>, vector<2x32xf32>
    %c0_1 = arith.constant 0 : index
    %c0_2 = arith.constant 0 : index
    %c0_3 = arith.constant 0 : index
    %1 = vector.load %arg2[%c0_1, %c0_2, %c0_3] : memref<8x2x32xf32, #tpu.memory_space<vmem>>, vector<8x2x32xf32>
    %2 = vector.shape_cast %0 : vector<2x32xf32> to vector<1x2x32xf32>
    %3 = vector.broadcast %2 : vector<1x2x32xf32> to vector<8x2x32xf32>
    %4 = arith.mulf %3, %1 : vector<8x2x32xf32>
    %5 = tpu.iota {dimensions = array<i32: 0>} : vector<32x4xi32>
    %6 = tpu.iota {dimensions = array<i32: 1>} : vector<32x4xi32>
    %c8_i32 = arith.constant 8 : i32
    %7 = vector.broadcast %c8_i32 : i32 to vector<32x4xi32>
    %8 = arith.muli %6, %7 : vector<32x4xi32>
    %9 = arith.cmpi sge, %5, %8 : vector<32x4xi32>
    %c8_i32_4 = arith.constant 8 : i32
    %10 = vector.broadcast %c8_i32_4 : i32 to vector<32x4xi32>
    %11 = arith.addi %8, %10 : vector<32x4xi32>
    %12 = arith.cmpi slt, %5, %11 : vector<32x4xi32>
    %13 = arith.andi %9, %12 : vector<32x4xi1>
    %14 = arith.extui %13 : vector<32x4xi1> to vector<32x4xi32>
    %15 = arith.sitofp %14 : vector<32x4xi32> to vector<32x4xf32>
    %16 = vector.shape_cast %4 : vector<8x2x32xf32> to vector<16x32xf32>
    %cst = arith.constant dense<0.000000e+00> : vector<16x4xf32>
    %17 = tpu.matmul %16, %15, %cst {dimension_numbers = #tpu.dot_dimension_numbers<[1], [0], [0], [1], [0, 0, 1, 1], [], []>} : vector<16x32xf32>, vector<32x4xf32>, vector<16x4xf32> -> vector<16x4xf32>
    %18 = vector.shape_cast %17 : vector<16x4xf32> to vector<8x2x4xf32>
    %cst_5 = arith.constant 5.000000e-01 : f32
    %19 = vector.broadcast %cst_5 : f32 to vector<8x2x4xf32>
    %20 = arith.mulf %18, %19 : vector<8x2x4xf32>
    %cst_6 = arith.constant dense<0xFF800000> : vector<2x4xf32>
    %21 = vector.multi_reduction <maximumf>, %20, %cst_6 [0] : vector<8x2x4xf32> to vector<2x4xf32>
    %22 = vector.shape_cast %21 : vector<2x4xf32> to vector<1x2x4xf32>
    %23 = vector.broadcast %22 : vector<1x2x4xf32> to vector<8x2x4xf32>
    %24 = arith.subf %20, %23 : vector<8x2x4xf32>
    %25 = math.exp %24 : vector<8x2x4xf32>
    %cst_7 = arith.constant dense<0.000000e+00> : vector<2x4xf32>
    %26 = vector.multi_reduction <add>, %25, %cst_7 [0] : vector<8x2x4xf32> to vector<2x4xf32>
    %27 = vector.shape_cast %26 : vector<2x4xf32> to vector<1x2x4xf32>
    %28 = vector.broadcast %27 : vector<1x2x4xf32> to vector<8x2x4xf32>
    %29 = arith.divf %25, %28 : vector<8x2x4xf32>
    %c0_8 = arith.constant 0 : index
    %c0_9 = arith.constant 0 : index
    %c0_10 = arith.constant 0 : index
    %30 = vector.load %arg3[%c0_8, %c0_9, %c0_10] : memref<8x2x4xf32, #tpu.memory_space<vmem>>, vector<8x2x4xf32>
    tpu.vector_store %arg3[%c0_8, %c0_9, %c0_10], %29 {strides = array<i32>} : memref<8x2x4xf32, #tpu.memory_space<vmem>>, vector<8x2x4xf32>,
    return
  }
  func.func @transform_0(%arg0: i32) -> (i32, i32) {
    %c0_i32 = arith.constant 0 : i32
    %c0_i32_0 = arith.constant 0 : i32
    return %arg0, %c0_i32 : i32, i32
  }
  func.func @transform_1(%arg0: i32) -> (i32, i32, i32) {
    %c0_i32 = arith.constant 0 : i32
    %c0_i32_0 = arith.constant 0 : i32
    %c0_i32_1 = arith.constant 0 : i32
    return %c0_i32, %arg0, %c0_i32_0 : i32, i32, i32
  }
  func.func @transform_2(%arg0: i32) -> (i32, i32, i32) {
    %c0_i32 = arith.constant 0 : i32
    %c0_i32_0 = arith.constant 0 : i32
    %c0_i32_1 = arith.constant 0 : i32
    return %c0_i32, %arg0, %c0_i32_0 : i32, i32, i32
  }
}

</mosaic_0001>

<bundles_post_ra>
// kernel: tpu_custom_call.1
= control target key start
LH: loop header
LB: loop body
LE: loop exit
PB: predicated region body
PF: predicated region fallthrough
CT: control target
= control target key end

     0   :  { %7 = vsyncpa [#allocation3], 0  ;;  %s553_s0 = inlined_call_operand.hbm [shape: f32[2,32], index: 0, kind: input, shape index: {}]   ;;  %s554_s1 = inlined_call_operand.hbm [shape: f32[8,2,32], index: 1, kind: input, shape index: {}]   ;;  %s555_s2 = inlined_call_operand.vmem [shape: f32[8,2,4], index: 2, kind: output, shape index: {}]  }
   0x1   :  { %8 = vsyncpa [#allocation5], 0  ;;  %s442_s9 = smov [#allocation2]   ;;  %s443_s11 = smov [#allocation4]  }
   0x2   :  { %s15_s10 = sshll.u32 %s442_s9, 4  ;;  %s24_s12 = sshll.u32 %s443_s11, 4  ;;  %s16_s10 = int_to_ptr.vmem [resolvable:$true] %s15_s10  ;;  %s463_s12 = int_to_ptr.vmem [resolvable:$true] %s24_s12 }
   0x3   :  { %s394_s15 = scalar_lea.hbm %s553_s0, 32 }
   0x4   :  { %p395_p0 = scmp.ne.s32.totalorder %s553_s0, %s394_s15  ;;  %p398_p1 = scmp.lt.u32.totalorder %s394_s15, %s553_s0 }
   0x6   :  { %p400_p2 = pnand %p398_p1, %p395_p0 }
   0x8   :  { %403 = shalt.err (!%p400_p2)
}
   0x9   :  { %s404_s20 = scalar_lea.vmem %s16_s10, 32  ;;  %p409_p4 = scmp.lt.s32.totalorder %s16_s10, %s16_s10 }
   0xa   :  { %p405_p3 = scmp.ne.s32.totalorder %s16_s10, %s404_s20  ;;  %p410_p5 = scmp.lt.s32.totalorder %s404_s20, %s404_s20 }
   0xc   :  { %p411_p6 = por %p410_p5, %p409_p4 }
   0xe   :  { %p412_p7 = pnand %p411_p6, %p405_p3 }
  0x10   :  { %415 = shalt.err (!%p412_p7)
}
  0x11   :  { %18 = dma.hbm_to_vmem [thread:$0]  %s553_s0, 32, %s16_s10, [#allocation3]  }
  0x12   :  { %s416_s25 = scalar_lea.hbm %s554_s1, 256 }
  0x13   :  { %p417_p8 = scmp.ne.s32.totalorder %s554_s1, %s416_s25  ;;  %p420_p9 = scmp.lt.u32.totalorder %s416_s25, %s554_s1 }
  0x15   :  { %p422_p10 = pnand %p420_p9, %p417_p8 }
  0x17   :  { %425 = shalt.err (!%p422_p10)
}
  0x18   :  { %s426_s30 = scalar_lea.vmem %s463_s12, 256  ;;  %p431_p12 = scmp.lt.s32.totalorder %s463_s12, %s463_s12 }
  0x19   :  { %p427_p11 = scmp.ne.s32.totalorder %s463_s12, %s426_s30  ;;  %p432_p13 = scmp.lt.s32.totalorder %s426_s30, %s426_s30 }
  0x1b   :  { %p433_p0 = por %p432_p13, %p431_p12 }
  0x1d   :  { %p434_p1 = pnand %p433_p0, %p427_p11 }
  0x1f   :  { %437 = shalt.err (!%p434_p1)
}
  0x20   :  { %s444_s0 = smov 32   ;;  %s445_s3 = smov 2  }
  0x21   :  { %30 = dma.hbm_to_vmem [thread:$0]  %s554_s1, 256, %s463_s12, [#allocation5], %s444_s0, %s444_s0, %s445_s3  }
  0x22   :  { %438 = dma.done.wait [#allocation3], 32  }
  0x23   :  { %439 = vsyncadd [#allocation3], 4294967264 }
  0x24   :  { %440 = dma.done.wait [#allocation5], 256  }
  0x25   :  { %441 = vsyncadd [#allocation5], 4294967040  ;;  %v54_v0 = vlaneseq  ;;  %v446_v1 = vmov 1983009808   ;;  %v37_v11 = vld [vmem:[#allocation2] sm:$0x3] }
  0x26   :  { %v94_v2 = vunpack.c.l.s4 %v446_v1  ;;  %v38_v12 = vld [vmem:[#allocation4] sm:$0x3]  ;;  %v39_v13 = vld [vmem:[#allocation4 + $0x2] sm:$0x3]  ;;  %v40_v15 = vld [vmem:[#allocation4 + $0x4] sm:$0x3] }
  0x27   :  { %v55_v3 = vshrl.u32 %v54_v0, 7  ;;  %v60_v4 = vand.u32 127, %v54_v0  ;;  %v41_v16 = vld [vmem:[#allocation4 + $0x6] sm:$0x3]  ;;  %v42_v17 = vld [vmem:[#allocation4 + $0x8] sm:$0x3]  ;;  %v46_v19 = vmul.f32 %v38_v12, %v37_v11  ;;  %v47_v20 = vmul.f32 %v39_v13, %v37_v11 }
  0x28   :  { %v95_v5 = vunpack.c.0.s8 %v94_v2  ;;  %v48_v21 = vmul.f32 %v40_v15, %v37_v11  ;;  %v49_v22 = vmul.f32 %v41_v16, %v37_v11  ;;  %v43_v23 = vld [vmem:[#allocation4 + $0xa] sm:$0x3]  ;;  %v44_v24 = vld [vmem:[#allocation4 + $0xc] sm:$0x3]  ;;  %v45_v25 = vld [vmem:[#allocation4 + $0xe] sm:$0x3]  ;;  %v50_v26 = vmul.f32 %v42_v17, %v37_v11 }
  0x29   :  { %v56_v6 = vadd.s32 8, %v55_v3  ;;  %v61_v7 = vmul.u32 8, %v60_v4  ;;  %v57_v8 = vadd.s32 16, %v55_v3  ;;  %v58_v9 = vadd.s32 24, %v55_v3 }
  0x2a   :  { %v98_v14 = vsub.s32 %v95_v5, %v55_v3  ;;  %v51_v27 = vmul.f32 %v43_v23, %v37_v11  ;;  %v52_v28 = vmul.f32 %v44_v24, %v37_v11  ;;  %v91_v29 = vcombine.low %v46_v19, %v47_v20 }
  0x2b   :  { %vm62_vm0 = vcmp.ge.s32.totalorder %v55_v3, %v61_v7  ;;  %v66_v10 = vadd.s32 8, %v61_v7  ;;  %vm63_vm1 = vcmp.ge.s32.totalorder %v56_v6, %v61_v7  ;;  %vm64_vm2 = vcmp.ge.s32.totalorder %v57_v8, %v61_v7 }
  0x2c   :  { %vm65_vm5 = vcmp.ge.s32.totalorder %v58_v9, %v61_v7  ;;  %v92_v30 = vcombine.low %v48_v21, %v49_v22  ;;  %v53_v31 = vmul.f32 %v45_v25, %v37_v11  ;;  %v447_v32 = vmov 1.0|1.0  }
  0x2d   :  { %vm67_vm3 = vcmp.lt.s32.totalorder %v55_v3, %v66_v10  ;;  %vm68_vm4 = vcmp.lt.s32.totalorder %v56_v6, %v66_v10  ;;  %vm69_vm6 = vcmp.lt.s32.totalorder %v57_v8, %v66_v10  ;;  %vm70_vm9 = vcmp.lt.s32.totalorder %v58_v9, %v66_v10 }
  0x2e   :  { %vm495_vm7 = vmand %vm62_vm0, %vm67_vm3  ;;  %v108_v33 = vcombine.low %v50_v26, %v51_v27  ;;  %v99_v34 = vrot.slane %v91_v29, %v98_v14  ;;  %v106_v35 = vrot.slane %v92_v30, %v98_v14  ;;  %v109_v36 = vcombine.low %v52_v28, %v53_v31 }
  0x2f   :  { %vm72_vm8 = vmand %vm63_vm1, %vm68_vm4  ;;  %vm125_vm14 = vcmask 261120   ;;  %vm257_vm15 = vcmask 25600  }
  0x30   :  { %vm362_vm10 = vmpackc.low %vm72_vm8, %vm495_vm7  ;;  %v116_v37 = vrot.slane %v108_v33, %v98_v14  ;;  %v107_v38 = vcombine.low %v99_v34, %v106_v35  ;;  %v123_v39 = vrot.slane %v109_v36, %v98_v14 }
  0x31   :  { %363 = vmatprep.subr.msk.bf16.mxu0 %vm362_vm10, %v447_v32  ;;  %vm73_vm11 = vmand %vm64_vm2, %vm69_vm6 }
  0x32   :  { %365 = vmatpush3.bf16.msk.msra.mxu0 %vm362_vm10, %v447_v32  ;;  %vm74_vm12 = vmand %vm65_vm5, %vm70_vm9  ;;  %359 = vmatprep.mubr.msk.f32.mxu0 %vm125_vm14, %v107_v38  ;;  %v124_v40 = vcombine.low %v116_v37, %v123_v39 }
  0x33   :  { %vm366_vm13 = vmpackc.low %vm74_vm12, %vm73_vm11 }
  0x34   :  { %367 = vmatprep.subr.msk.bf16.mxu0 %vm366_vm13, %v447_v32 }
  0x36   :  { %369 = vmatpush3.bf16.msk.msra.mxu0 %vm366_vm13, %v447_v32 }
  0x39   :  { %360 = vmatmul.mubr.msk.f32.vlgmr.msra.gmra.mrb[0].mxu0 %vm125_vm14, %v124_v40 }
 0x10c   :  { %v361_v41 = vpop.f32.mrb[0].mxu0 }
 0x10d   :  { %v224_v42 = vcombine.high %v361_v41, %v361_v41  ;;  %v231_v43 = vrot.slane %v361_v41, %v98_v14  ;;  %v196_v44 = vpop.f32.mrb[1].mxu0 }
 0x10e   :  { %v207_v45 = vcombine.high %v196_v44, %v196_v44  ;;  %v214_v46 = vrot.slane %v196_v44, %v98_v14 }
 0x10f   :  { %v238_v47 = vrot.slane %v224_v42, %v98_v14  ;;  %v239_v48 = vcombine.high %v231_v43, %v231_v43  ;;  %v253_v49 = vmul.f32 0.5, %v231_v43 }
 0x110   :  { %v221_v50 = vrot.slane %v207_v45, %v98_v14  ;;  %v222_v51 = vcombine.high %v214_v46, %v214_v46  ;;  %v249_v52 = vmul.f32 0.5, %v214_v46 }
 0x111   :  { %v240_v53 = vcombine.high %v238_v47, %v238_v47  ;;  %v254_v54 = vmul.f32 0.5, %v239_v48  ;;  %v255_v55 = vmul.f32 0.5, %v238_v47  ;;  %v262_v56 = vsel %vm257_vm15, %v253_v49, -inf }
 0x112   :  { %v223_v57 = vcombine.high %v221_v50, %v221_v50  ;;  %v250_v58 = vmul.f32 0.5, %v222_v51  ;;  %v251_v59 = vmul.f32 0.5, %v221_v50  ;;  %v258_v60 = vsel %vm257_vm15, %v249_v52, -inf }
 0x113   :  { %v256_v61 = vmul.f32 0.5, %v240_v53  ;;  %v264_v62 = vsel %vm257_vm15, %v254_v54, -inf  ;;  %v266_v63 = vsel %vm257_vm15, %v255_v55, -inf  ;;  %v263_v0 = vmax.f32 %v258_v60, %v262_v56 }
 0x114   :  { %v252_v1 = vmul.f32 0.5, %v223_v57  ;;  %v259_v2 = vsel %vm257_vm15, %v250_v58, -inf  ;;  %v260_v3 = vsel %vm257_vm15, %v251_v59, -inf }
 0x115   :  { %v268_v4 = vsel %vm257_vm15, %v256_v61, -inf  ;;  %v265_v5 = vmax.f32 %v259_v2, %v264_v62  ;;  %v267_v6 = vmax.f32 %v260_v3, %v266_v63 }
 0x116   :  { %v261_v7 = vsel %vm257_vm15, %v252_v1, -inf }
 0x117   :  { %v269_v8 = vmax.f32 %v261_v7, %v268_v4  ;;  %v270_v9 = vmax.f32 %v263_v0, %v265_v5 }
 0x119   :  { %v271_v10 = vmax.f32 %v267_v6, %v269_v8 }
 0x11b   :  { %v272_v11 = vmax.f32 %v270_v9, %v271_v10 }
 0x11d   :  { %v273_v12 = vsub.f32 %v249_v52, %v272_v11  ;;  %v274_v13 = vsub.f32 %v250_v58, %v272_v11  ;;  %v275_v14 = vsub.f32 %v251_v59, %v272_v11  ;;  %v276_v15 = vsub.f32 %v252_v1, %v272_v11 }
 0x11e   :  { %v277_v16 = vsub.f32 %v253_v49, %v272_v11  ;;  %v278_v17 = vsub.f32 %v254_v54, %v272_v11  ;;  %v279_v18 = vsub.f32 %v255_v55, %v272_v11  ;;  %v280_v19 = vsub.f32 %v256_v61, %v272_v11 }
 0x11f   :  { %v281_v20 = vmul.f32 1.442695, %v273_v12  ;;  %v283_v21 = vmul.f32 1.442695, %v274_v13  ;;  %v285_v22 = vmul.f32 1.442695, %v275_v14 }
 0x120   :  { %v287_v23 = vmul.f32 1.442695, %v276_v15  ;;  %v289_v24 = vmul.f32 1.442695, %v277_v16  ;;  %v291_v25 = vmul.f32 1.442695, %v278_v17 }
 0x121   :  { %376 = vpow2.f32 %v281_v20  ;;  %v293_v26 = vmul.f32 1.442695, %v279_v18  ;;  %v295_v27 = vmul.f32 1.442695, %v280_v19 }
 0x122   :  { %378 = vpow2.f32 %v283_v21 }
 0x123   :  { %380 = vpow2.f32 %v285_v22 }
 0x124   :  { %382 = vpow2.f32 %v287_v23 }
 0x125   :  { %384 = vpow2.f32 %v289_v24 }
 0x126   :  { %386 = vpow2.f32 %v291_v25 }
 0x127   :  { %388 = vpow2.f32 %v293_v26 }
 0x128   :  { %390 = vpow2.f32 %v295_v27 }
 0x12b   :  { %v377_v28 = vpop.eup %376 }
 0x12c   :  { %v379_v29 = vpop.eup %378  ;;  %v297_v30 = vsel %vm257_vm15, %v377_v28, 0.0 }
 0x12d   :  { %v381_v31 = vpop.eup %380  ;;  %v298_v32 = vsel %vm257_vm15, %v379_v29, 0.0 }
 0x12e   :  { %v383_v33 = vpop.eup %382  ;;  %v299_v34 = vadd.f32 %v298_v32, %v297_v30  ;;  %v300_v35 = vsel %vm257_vm15, %v381_v31, 0.0 }
 0x12f   :  { %v385_v36 = vpop.eup %384  ;;  %v302_v38 = vsel %vm257_vm15, %v383_v33, 0.0 }
 0x130   :  { %v301_v37 = vadd.f32 %v300_v35, %v299_v34  ;;  %v387_v39 = vpop.eup %386  ;;  %v304_v41 = vsel %vm257_vm15, %v385_v36, 0.0 }
 0x131   :  { %v389_v42 = vpop.eup %388  ;;  %v306_v44 = vsel %vm257_vm15, %v387_v39, 0.0 }
 0x132   :  { %v303_v40 = vadd.f32 %v302_v38, %v301_v37  ;;  %v391_v45 = vpop.eup %390  ;;  %v308_v47 = vsel %vm257_vm15, %v389_v42, 0.0 }
 0x133   :  { %v310_v49 = vsel %vm257_vm15, %v391_v45, 0.0 }
 0x134   :  { %v305_v43 = vadd.f32 %v304_v41, %v303_v40 }
 0x136   :  { %v307_v46 = vadd.f32 %v306_v44, %v305_v43 }
 0x138   :  { %v309_v48 = vadd.f32 %v308_v47, %v307_v46 }
 0x13a   :  { %v311_v50 = vadd.f32 %v310_v49, %v309_v48 }
 0x13c   :  { %392 = vrcp.f32 %v311_v50 }
 0x146   :  { %v393_v51 = vpop.eup %392 }
 0x147   :  { %v313_v52 = vmul.f32 %v393_v51, %v377_v28  ;;  %v314_v53 = vmul.f32 %v393_v51, %v379_v29  ;;  %v315_v54 = vmul.f32 %v393_v51, %v381_v31  ;;  %v316_v55 = vmul.f32 %v393_v51, %v383_v33 }
 0x148   :  { %v317_v56 = vmul.f32 %v393_v51, %v385_v36  ;;  %v318_v57 = vmul.f32 %v393_v51, %v387_v39  ;;  %v319_v58 = vmul.f32 %v393_v51, %v389_v42  ;;  %v320_v59 = vmul.f32 %v393_v51, %v391_v45 }
 0x149   :  { %321 = vst.msk [vmem:[%s555_s2] sm:$0x3] %vm257_vm15, %v313_v52  ;;  %322 = vst.msk [vmem:[%s555_s2 + $0x2] sm:$0x3] %vm257_vm15, %v314_v53 }
 0x14a   :  { %323 = vst.msk [vmem:[%s555_s2 + $0x4] sm:$0x3] %vm257_vm15, %v315_v54  ;;  %324 = vst.msk [vmem:[%s555_s2 + $0x6] sm:$0x3] %vm257_vm15, %v316_v55 }
 0x14b   :  { %325 = vst.msk [vmem:[%s555_s2 + $0x8] sm:$0x3] %vm257_vm15, %v317_v56  ;;  %326 = vst.msk [vmem:[%s555_s2 + $0xa] sm:$0x3] %vm257_vm15, %v318_v57 }
 0x14c   :  { %327 = vst.msk [vmem:[%s555_s2 + $0xc] sm:$0x3] %vm257_vm15, %v319_v58  ;;  %328 = vst.msk [vmem:[%s555_s2 + $0xe] sm:$0x3] %vm257_vm15, %v320_v59 }
 0x14d   :  { %333 = vsyncpa [#allocation3], 1 }
 0x14e   :  { %334 = vsyncpa [#allocation5], 1 }

</bundles_post_ra>
